<compile_context>
chip_gen: v5e
topology: v5e:2x2
jax: 0.10.0
libtpu: 0.0.40
codegen_flags: <defaults>
</compile_context>

<pallas_src>
import jax
import jax.numpy as jnp
from jax.experimental import pallas as pl
from jax.experimental.pallas import tpu as pltpu

# ---- problem sizes (small, consistent with the module) ----
B = 2        # batch
N = 8        # sequence length
DIM = 32     # embedding dim
HEADS = 4
DH = DIM // HEADS            # per-head dim
SCALE = DIM ** (-0.5)        # module uses dim**-0.5 (not head_dim**-0.5)


def attention_kernel(x_ref, wq_ref, wk_ref, wv_ref, wo_ref, b_ref, o_ref):
    """Single invocation, whole problem on-chip.
    x_ref:  (B, N, DIM)      f32   activations
    wq_ref: (G, DIM, DH)     bf16  per-(head,batch) Q weights, softmax scale folded in
    wk_ref: (G, DIM, DH)     bf16
    wv_ref: (G, DIM, DH)     bf16
    wo_ref: (G, DH, DIM)     bf16  per-(head,batch) slices of the output projection
    b_ref:  (1, DIM)         f32   output-projection bias
    o_ref:  (B, N, DIM)      f32
    where G = HEADS * B and g = h * B + b.
    """
    b, n, d = x_ref.shape
    g, _, dh = wq_ref.shape
    h = g // b

    # In-kernel bf16 cast of the activations (review item: don't pay a wrapper HBM pass).
    x = x_ref[...].astype(jnp.bfloat16)                                   # (B, N, D)
    # Replicate rows across heads on the *outer* axis only (no lane/sublane movement).
    xg = jnp.broadcast_to(x[None], (h, b, n, d)).reshape(g, n, d)         # (G, N, D)

    # Head-batched QKV projections: q/k/v land directly as (G, N, DH) -- heads on the
    # batch axis, so no width-8 lane slices and no transposes downstream.
    q = jnp.einsum('gnd,gdk->gnk', xg, wq_ref[...],
                   preferred_element_type=jnp.float32)                    # (G, N, DH)
    k = jnp.einsum('gnd,gdk->gnk', xg, wk_ref[...],
                   preferred_element_type=jnp.float32)
    v = jnp.einsum('gnd,gdk->gnk', xg, wv_ref[...],
                   preferred_element_type=jnp.float32)

    # One batched scores matmul + ONE softmax over all (head, batch) pairs.
    s = jnp.einsum('gqd,gkd->gqk', q.astype(jnp.bfloat16), k.astype(jnp.bfloat16),
                   preferred_element_type=jnp.float32)                    # (G, N, N)
    m = jnp.max(s, axis=-1, keepdims=True)                                # f32 tail (v5e)
    e = jnp.exp(s - m)
    denom = jnp.sum(e, axis=-1, keepdims=True)
    attn = e * pl.reciprocal(denom, approx=True)                          # EUP reciprocal

    out = jnp.einsum('gqk,gkd->gqd', attn.astype(jnp.bfloat16), v.astype(jnp.bfloat16),
                     preferred_element_type=jnp.float32)                  # (G, N, DH)

    # Output projection, still head-batched.  The 'b h n d -> b n (h d)' merge followed
    # by the Linear is algebraically a sum over heads of per-head (N,DH)@(DH,DIM) --
    # so no VMEM merge scratch and no masked narrow stores.
    y = jnp.einsum('gnd,gdk->gnk', out.astype(jnp.bfloat16), wo_ref[...],
                   preferred_element_type=jnp.float32)                    # (G, N, D)
    y = jnp.sum(y.reshape(h, b, n, d), axis=0) + b_ref[...]               # (B, N, D)
    o_ref[...] = y.astype(o_ref.dtype)


def attention_pallas(x, w_qkv_t, w_out_t, b_out):
    """x: (B, N, DIM) f32; w_qkv_t: (DIM, 3*DIM); w_out_t: (DIM, DIM); b_out: (1, DIM).
    Weights are the pre-transposed torch weights (kernel computes x @ W)."""
    B_, N_, D_ = x.shape
    G_ = HEADS * B_

    # --- one-time weight prep (wrapper-side XLA; fuses with the bf16 cast) ---
    # Per-head stacks: wq/wk/wv -> (HEADS, DIM, DH); output projection -> (HEADS, DH, DIM).
    wq = (w_qkv_t[:, 0 * D_:1 * D_] * SCALE).reshape(D_, HEADS, DH).transpose(1, 0, 2)
    wk = w_qkv_t[:, 1 * D_:2 * D_].reshape(D_, HEADS, DH).transpose(1, 0, 2)
    wv = w_qkv_t[:, 2 * D_:3 * D_].reshape(D_, HEADS, DH).transpose(1, 0, 2)
    wo = w_out_t.reshape(HEADS, DH, D_)

    def rep(w):  # replicate across batch on the leading axis: g = h * B + b
        tgt = (HEADS, B_) + w.shape[1:]
        return jnp.broadcast_to(w[:, None], tgt).reshape((G_,) + w.shape[1:]).astype(jnp.bfloat16)

    wq_g, wk_g, wv_g, wo_g = rep(wq), rep(wk), rep(wv), rep(wo)

    vmem_specs = [pl.BlockSpec(memory_space=pltpu.MemorySpace.VMEM) for _ in range(6)]

    y = pl.pallas_call(
        attention_kernel,
        out_shape=jax.ShapeDtypeStruct((B_, N_, D_), jnp.float32),
        in_specs=vmem_specs,
        out_specs=pl.BlockSpec(memory_space=pltpu.MemorySpace.VMEM),
    )(x, wq_g, wk_g, wv_g, wo_g, b_out)

    return y


def attention_ref(x, w_qkv_t, w_out_t, b_out):
    """Plain-JAX f32 reference mirroring the PyTorch forward (mask=None)."""
    qkv = x @ w_qkv_t                                  # (B, N, 3*DIM)
    q, k, v = jnp.split(qkv, 3, axis=-1)

    def to_heads(t):                                   # (B, N, DIM) -> (B, H, N, DH)
        b, n, _ = t.shape
        return t.reshape(b, n, HEADS, DH).transpose(0, 2, 1, 3)

    q, k, v = map(to_heads, (q, k, v))
    dots = jnp.einsum('bhid,bhjd->bhij', q, k) * SCALE
    attn = jax.nn.softmax(dots, axis=-1)
    out = jnp.einsum('bhij,bhjd->bhid', attn, v)
    b, h, n, dh = out.shape
    out = out.transpose(0, 2, 1, 3).reshape(b, n, h * dh)
    return out @ w_out_t + b_out


if __name__ == "__main__":
    key = jax.random.PRNGKey(0)
    kx, kqkv, kwo, kbo = jax.random.split(key, 4)

    x = jax.random.normal(kx, (B, N, DIM), dtype=jnp.float32)
    # nn.Linear(dim, 3*dim, bias=False): torch weight (3*dim, dim); pass transposed.
    w_qkv_t = jax.random.normal(kqkv, (DIM, 3 * DIM), dtype=jnp.float32) * 0.02
    # nn.Linear(dim, dim): torch weight (dim, dim) + bias (dim,); pass weight transposed.
    w_out_t = jax.random.normal(kwo, (DIM, DIM), dtype=jnp.float32) * 0.02
    b_out = jax.random.normal(kbo, (1, DIM), dtype=jnp.float32) * 0.02

    y = attention_pallas(x, w_qkv_t, w_out_t, b_out)
    y = jax.block_until_ready(y)

    y_ref = attention_ref(x, w_qkv_t, w_out_t, b_out)
    assert y.shape == (B, N, DIM)
    assert jnp.allclose(y, y_ref, rtol=2e-2, atol=2e-2), "mismatch vs reference"

    print("KERNEL_OK")
</pallas_src>

<mosaic_0001>
module attributes {stable_mosaic.version = 11 : i64} {
  func.func @attention_kernel(%arg0: memref<2x8x32xf32, #tpu.memory_space<vmem>>, %arg1: memref<8x32x8xbf16, #tpu.memory_space<vmem>>, %arg2: memref<8x32x8xbf16, #tpu.memory_space<vmem>>, %arg3: memref<8x32x8xbf16, #tpu.memory_space<vmem>>, %arg4: memref<8x8x32xbf16, #tpu.memory_space<vmem>>, %arg5: memref<1x32xf32, #tpu.memory_space<vmem>>, %arg6: memref<2x8x32xf32, #tpu.memory_space<vmem>>) attributes {dimension_semantics = [], scalar_prefetch = 0 : i64, scratch_operands = 0 : i64, tpu.core_type = #tpu.core_type<tc>} {
    %c0 = arith.constant 0 : index
    %c0_0 = arith.constant 0 : index
    %c0_1 = arith.constant 0 : index
    %0 = vector.load %arg0[%c0, %c0_0, %c0_1] : memref<2x8x32xf32, #tpu.memory_space<vmem>>, vector<2x8x32xf32>
    %1 = arith.truncf %0 : vector<2x8x32xf32> to vector<2x8x32xbf16>
    %2 = vector.shape_cast %1 : vector<2x8x32xbf16> to vector<1x2x8x32xbf16>
    %3 = vector.shape_cast %2 : vector<1x2x8x32xbf16> to vector<1x2x8x32xbf16>
    %4 = vector.broadcast %3 : vector<1x2x8x32xbf16> to vector<4x2x8x32xbf16>
    %5 = vector.shape_cast %4 : vector<4x2x8x32xbf16> to vector<8x8x32xbf16>
    %c0_2 = arith.constant 0 : index
    %c0_3 = arith.constant 0 : index
    %c0_4 = arith.constant 0 : index
    %6 = vector.load %arg1[%c0_2, %c0_3, %c0_4] : memref<8x32x8xbf16, #tpu.memory_space<vmem>>, vector<8x32x8xbf16>
    "tpu.trace_start"() <{level = 10 : i32, message = "gnd,gdk->gnk"}> : () -> ()
    %cst = arith.constant dense<0.000000e+00> : vector<8x8x8xf32>
    %7 = tpu.matmul %5, %6, %cst {dimension_numbers = #tpu.dot_dimension_numbers<[2], [1], [1], [2], [0, 0, 0, 1, 1, 2], [0], [0]>} : vector<8x8x32xbf16>, vector<8x32x8xbf16>, vector<8x8x8xf32> -> vector<8x8x8xf32>
    "tpu.trace_stop"() : () -> ()
    %c0_5 = arith.constant 0 : index
    %c0_6 = arith.constant 0 : index
    %c0_7 = arith.constant 0 : index
    %8 = vector.load %arg2[%c0_5, %c0_6, %c0_7] : memref<8x32x8xbf16, #tpu.memory_space<vmem>>, vector<8x32x8xbf16>
    "tpu.trace_start"() <{level = 10 : i32, message = "gnd,gdk->gnk"}> : () -> ()
    %cst_8 = arith.constant dense<0.000000e+00> : vector<8x8x8xf32>
    %9 = tpu.matmul %5, %8, %cst_8 {dimension_numbers = #tpu.dot_dimension_numbers<[2], [1], [1], [2], [0, 0, 0, 1, 1, 2], [0], [0]>} : vector<8x8x32xbf16>, vector<8x32x8xbf16>, vector<8x8x8xf32> -> vector<8x8x8xf32>
    "tpu.trace_stop"() : () -> ()
    %c0_9 = arith.constant 0 : index
    %c0_10 = arith.constant 0 : index
    %c0_11 = arith.constant 0 : index
    %10 = vector.load %arg3[%c0_9, %c0_10, %c0_11] : memref<8x32x8xbf16, #tpu.memory_space<vmem>>, vector<8x32x8xbf16>
    "tpu.trace_start"() <{level = 10 : i32, message = "gnd,gdk->gnk"}> : () -> ()
    %cst_12 = arith.constant dense<0.000000e+00> : vector<8x8x8xf32>
    %11 = tpu.matmul %5, %10, %cst_12 {dimension_numbers = #tpu.dot_dimension_numbers<[2], [1], [1], [2], [0, 0, 0, 1, 1, 2], [0], [0]>} : vector<8x8x32xbf16>, vector<8x32x8xbf16>, vector<8x8x8xf32> -> vector<8x8x8xf32>
    "tpu.trace_stop"() : () -> ()
    %12 = arith.truncf %7 : vector<8x8x8xf32> to vector<8x8x8xbf16>
    %13 = arith.truncf %9 : vector<8x8x8xf32> to vector<8x8x8xbf16>
    "tpu.trace_start"() <{level = 10 : i32, message = "gqd,gkd->gqk"}> : () -> ()
    %cst_13 = arith.constant dense<0.000000e+00> : vector<8x8x8xf32>
    %14 = tpu.matmul %12, %13, %cst_13 {dimension_numbers = #tpu.dot_dimension_numbers<[2], [2], [1], [1], [0, 0, 0, 1, 1, 1], [0], [0]>} : vector<8x8x8xbf16>, vector<8x8x8xbf16>, vector<8x8x8xf32> -> vector<8x8x8xf32>
    "tpu.trace_stop"() : () -> ()
    %cst_14 = arith.constant dense<0xFF800000> : vector<8x8xf32>
    %15 = vector.multi_reduction <maximumf>, %14, %cst_14 [2] : vector<8x8x8xf32> to vector<8x8xf32>
    %16 = vector.shape_cast %15 : vector<8x8xf32> to vector<8x8x1xf32>
    %17 = vector.broadcast %16 : vector<8x8x1xf32> to vector<8x8x8xf32>
    %18 = arith.subf %14, %17 : vector<8x8x8xf32>
    %19 = math.exp %18 : vector<8x8x8xf32>
    %cst_15 = arith.constant dense<0.000000e+00> : vector<8x8xf32>
    %20 = vector.multi_reduction <add>, %19, %cst_15 [2] : vector<8x8x8xf32> to vector<8x8xf32>
    %21 = vector.shape_cast %20 : vector<8x8xf32> to vector<8x8x1xf32>
    %22 = tpu.reciprocal %21 {approx = true} : vector<8x8x1xf32> -> vector<8x8x1xf32>
    %23 = vector.broadcast %22 : vector<8x8x1xf32> to vector<8x8x8xf32>
    %24 = arith.mulf %19, %23 : vector<8x8x8xf32>
    %25 = arith.truncf %24 : vector<8x8x8xf32> to vector<8x8x8xbf16>
    %26 = arith.truncf %11 : vector<8x8x8xf32> to vector<8x8x8xbf16>
    "tpu.trace_start"() <{level = 10 : i32, message = "gqk,gkd->gqd"}> : () -> ()
    %cst_16 = arith.constant dense<0.000000e+00> : vector<8x8x8xf32>
    %27 = tpu.matmul %25, %26, %cst_16 {dimension_numbers = #tpu.dot_dimension_numbers<[2], [1], [1], [2], [0, 0, 0, 1, 1, 2], [0], [0]>} : vector<8x8x8xbf16>, vector<8x8x8xbf16>, vector<8x8x8xf32> -> vector<8x8x8xf32>
    "tpu.trace_stop"() : () -> ()
    %28 = arith.truncf %27 : vector<8x8x8xf32> to vector<8x8x8xbf16>
    %c0_17 = arith.constant 0 : index
    %c0_18 = arith.constant 0 : index
    %c0_19 = arith.constant 0 : index
    %29 = vector.load %arg4[%c0_17, %c0_18, %c0_19] : memref<8x8x32xbf16, #tpu.memory_space<vmem>>, vector<8x8x32xbf16>
    "tpu.trace_start"() <{level = 10 : i32, message = "gnd,gdk->gnk"}> : () -> ()
    %cst_20 = arith.constant dense<0.000000e+00> : vector<8x8x32xf32>
    %30 = tpu.matmul %28, %29, %cst_20 {dimension_numbers = #tpu.dot_dimension_numbers<[2], [1], [1], [2], [0, 0, 0, 1, 1, 2], [0], [0]>} : vector<8x8x8xbf16>, vector<8x8x32xbf16>, vector<8x8x32xf32> -> vector<8x8x32xf32>
    "tpu.trace_stop"() : () -> ()
    %31 = vector.shape_cast %30 : vector<8x8x32xf32> to vector<4x2x8x32xf32>
    %cst_21 = arith.constant dense<0.000000e+00> : vector<2x8x32xf32>
    %32 = vector.multi_reduction <add>, %31, %cst_21 [0] : vector<4x2x8x32xf32> to vector<2x8x32xf32>
    %c0_22 = arith.constant 0 : index
    %c0_23 = arith.constant 0 : index
    %33 = vector.load %arg5[%c0_22, %c0_23] : memref<1x32xf32, #tpu.memory_space<vmem>>, vector<1x32xf32>
    %34 = vector.shape_cast %33 : vector<1x32xf32> to vector<1x1x32xf32>
    %35 = vector.broadcast %34 : vector<1x1x32xf32> to vector<2x8x32xf32>
    %36 = arith.addf %32, %35 : vector<2x8x32xf32>
    %c0_24 = arith.constant 0 : index
    %c0_25 = arith.constant 0 : index
    %c0_26 = arith.constant 0 : index
    %37 = vector.load %arg6[%c0_24, %c0_25, %c0_26] : memref<2x8x32xf32, #tpu.memory_space<vmem>>, vector<2x8x32xf32>
    tpu.vector_store %arg6[%c0_24, %c0_25, %c0_26], %36 {strides = array<i32>} : memref<2x8x32xf32, #tpu.memory_space<vmem>>, vector<2x8x32xf32>,
    return
  }
}

</mosaic_0001>

<bundles_post_ra>
// kernel: tpu_custom_call.1
= control target key start
LH: loop header
LB: loop body
LE: loop exit
PB: predicated region body
PF: predicated region fallthrough
CT: control target
= control target key end

     0   :  { %vm73_vm0 = vcmask 261120   ;;  %s2060_s0 = inlined_call_operand.vmem [shape: f32[2,8,32], index: 0, kind: input, shape index: {}]   ;;  %s2061_s1 = inlined_call_operand.vmem [shape: bf16[8,32,8], index: 1, kind: input, shape index: {}]   ;;  %s2062_s2 = inlined_call_operand.vmem [shape: bf16[8,32,8], index: 2, kind: input, shape index: {}]   ;;  %s2063_s3 = inlined_call_operand.vmem [shape: bf16[8,32,8], index: 3, kind: input, shape index: {}]   ;;  %s2064_s4 = inlined_call_operand.vmem [shape: bf16[8,8,32], index: 4, kind: input, shape index: {}]   ;;  %s2065_s5 = inlined_call_operand.vmem [shape: f32[1,32], index: 5, kind: input, shape index: {}]   ;;  %s2066_s6 = inlined_call_operand.hbm [shape: f32[2,8,32], index: 6, kind: output, shape index: {}]  }
   0x1   :  { %v1607_v0 = vld [vmem:[%s2061_s1 + $0x8] sm:$0xff]  ;;  %v1609_v1 = vld [vmem:[%s2061_s1 + $0x18] sm:$0xff]  ;;  %v1606_v4 = vld [vmem:[%s2061_s1] sm:$0xff] }
   0x2   :  { %v1611_v2 = vld [vmem:[%s2061_s1 + $0x28] sm:$0xff]  ;;  %v1613_v3 = vld [vmem:[%s2061_s1 + $0x38] sm:$0xff]  ;;  %83 = vmatpush.bf16.msra.mxu0 %v1607_v0  ;;  %111 = vmatpush.bf16.msra.mxu1 %v1609_v1  ;;  %v1608_v5 = vld [vmem:[%s2061_s1 + $0x10] sm:$0xff] }
   0x3   :  { %v25_v6 = vld [vmem:[%s2060_s0] sm:$0xff]  ;;  %136 = vmatpush.bf16.msra.mxu2 %v1611_v2  ;;  %161 = vmatpush.bf16.msra.mxu3 %v1613_v3  ;;  %v1612_v8 = vld [vmem:[%s2061_s1 + $0x30] sm:$0xff]  ;;  %v26_v9 = vld [vmem:[%s2060_s0 + $0x8] sm:$0xff] }
   0x4   :  { %v1610_v7 = vld [vmem:[%s2061_s1 + $0x20] sm:$0xff]  ;;  %v1615_v10 = vld [vmem:[%s2061_s1 + $0x48] sm:$0xff]  ;;  %v1617_v11 = vld [vmem:[%s2061_s1 + $0x58] sm:$0xff]  ;;  %v1790_v12 = vpack.c.bf16 %v25_v6, %v25_v6  ;;  %v1792_v13 = vpack.c.bf16 %v26_v9, %v26_v9 }
   0x5   :  { %v1619_v14 = vld [vmem:[%s2061_s1 + $0x68] sm:$0xff]  ;;  %v1621_v15 = vld [vmem:[%s2061_s1 + $0x78] sm:$0xff]  ;;  %v1614_v16 = vld [vmem:[%s2061_s1 + $0x40] sm:$0xff] }
   0x6   :  { %84 = vmatpush.bf16.msra.mxu0 %v1606_v4  ;;  %112 = vmatpush.bf16.msra.mxu1 %v1608_v5  ;;  %v1616_v17 = vld [vmem:[%s2061_s1 + $0x50] sm:$0xff]  ;;  %v1623_v18 = vld [vmem:[%s2062_s2 + $0x8] sm:$0xff]  ;;  %v1625_v19 = vld [vmem:[%s2062_s2 + $0x18] sm:$0xff] }
   0x7   :  { %137 = vmatpush.bf16.msra.mxu2 %v1610_v7  ;;  %162 = vmatpush.bf16.msra.mxu3 %v1612_v8 }
   0x9   :  { %1374 = vmatmul.msk.bf16.vlgmr.msra.gmra.mxu0 %vm73_vm0, %v1790_v12  ;;  %1383 = vmatmul.msk.bf16.vlgmr.msra.gmra.mxu1 %vm73_vm0, %v1792_v13 }
   0xa   :  { %186 = vmatpush.bf16.msrb.mxu0 %v1615_v10  ;;  %211 = vmatpush.bf16.msrb.mxu1 %v1617_v11 }
   0xb   :  { %11 = vsyncpa [#allocation3], 0  ;;  %1392 = vmatmul.msk.bf16.vlgmr.msra.gmra.mxu2 %vm73_vm0, %v1790_v12  ;;  %1401 = vmatmul.msk.bf16.vlgmr.msra.gmra.mxu3 %vm73_vm0, %v1792_v13  ;;  %v1618_v20 = vld [vmem:[%s2061_s1 + $0x60] sm:$0xff]  ;;  %v1620_v21 = vld [vmem:[%s2061_s1 + $0x70] sm:$0xff]  ;;  %vm748_vm1 = vcmask 64512   ;;  %vm1008_vm2 = vcmask 1043456  }
   0xc   :  { %236 = vmatpush.bf16.msrb.mxu2 %v1619_v14  ;;  %261 = vmatpush.bf16.msrb.mxu3 %v1621_v15  ;;  %v1627_v22 = vld [vmem:[%s2062_s2 + $0x28] sm:$0xff]  ;;  %v1629_v23 = vld [vmem:[%s2062_s2 + $0x38] sm:$0xff]  ;;  %v1622_v24 = vld [vmem:[%s2062_s2] sm:$0xff]  ;;  %s1716_s8 = smov [#allocation2]   ;;  %s1354_s11 = sshll.u32 %s2066_s6, 4  ;;  %s1355_s11 = int_to_ptr.hbm [resolvable:$true] %s1354_s11 }
   0xd   :  { %v1624_v25 = vld [vmem:[%s2062_s2 + $0x10] sm:$0xff]  ;;  %v1626_v26 = vld [vmem:[%s2062_s2 + $0x20] sm:$0xff]  ;;  %v1631_v28 = vld [vmem:[%s2062_s2 + $0x48] sm:$0xff]  ;;  %s1717_s12 = smov 128   ;;  %s1718_s13 = smov 8  }
   0xe   :  { %187 = vmatpush.bf16.msrb.mxu0 %v1614_v16  ;;  %212 = vmatpush.bf16.msrb.mxu1 %v1616_v17  ;;  %v1628_v27 = vld [vmem:[%s2062_s2 + $0x30] sm:$0xff]  ;;  %v1633_v29 = vld [vmem:[%s2062_s2 + $0x58] sm:$0xff]  ;;  %v1635_v30 = vld [vmem:[%s2062_s2 + $0x68] sm:$0xff] }
   0xf   :  { %v1637_v31 = vld [vmem:[%s2062_s2 + $0x78] sm:$0xff]  ;;  %v1630_v32 = vld [vmem:[%s2062_s2 + $0x40] sm:$0xff]  ;;  %v1632_v33 = vld [vmem:[%s2062_s2 + $0x50] sm:$0xff] }
  0x10   :  { %237 = vmatpush.bf16.msrb.mxu2 %v1618_v20  ;;  %262 = vmatpush.bf16.msrb.mxu3 %v1620_v21  ;;  %v1634_v34 = vld [vmem:[%s2062_s2 + $0x60] sm:$0xff]  ;;  %v1636_v35 = vld [vmem:[%s2062_s2 + $0x70] sm:$0xff]  ;;  %v1639_v36 = vld [vmem:[%s2063_s3 + $0x8] sm:$0xff] }
  0x11   :  { %v1641_v37 = vld [vmem:[%s2063_s3 + $0x18] sm:$0xff]  ;;  %v1643_v38 = vld [vmem:[%s2063_s3 + $0x28] sm:$0xff]  ;;  %v1642_v39 = vld [vmem:[%s2063_s3 + $0x20] sm:$0xff] }
  0x12   :  { %318 = vmatpush.bf16.msra.mxu0 %v1623_v18  ;;  %343 = vmatpush.bf16.msra.mxu1 %v1625_v19  ;;  %v1638_v40 = vld [vmem:[%s2063_s3] sm:$0xff]  ;;  %v1640_v41 = vld [vmem:[%s2063_s3 + $0x10] sm:$0xff]  ;;  %v1645_v42 = vld [vmem:[%s2063_s3 + $0x38] sm:$0xff] }
  0x13   :  { %v1644_v43 = vld [vmem:[%s2063_s3 + $0x30] sm:$0xff]  ;;  %v1647_v44 = vld [vmem:[%s2063_s3 + $0x48] sm:$0xff]  ;;  %v1649_v45 = vld [vmem:[%s2063_s3 + $0x58] sm:$0xff] }
  0x14   :  { %368 = vmatpush.bf16.msra.mxu2 %v1627_v22  ;;  %393 = vmatpush.bf16.msra.mxu3 %v1629_v23  ;;  %v1651_v46 = vld [vmem:[%s2063_s3 + $0x68] sm:$0xff]  ;;  %v1650_v47 = vld [vmem:[%s2063_s3 + $0x60] sm:$0xff]  ;;  %v1648_v49 = vld [vmem:[%s2063_s3 + $0x50] sm:$0xff] }
  0x15   :  { %v1646_v48 = vld [vmem:[%s2063_s3 + $0x40] sm:$0xff]  ;;  %v1653_v50 = vld [vmem:[%s2063_s3 + $0x78] sm:$0xff]  ;;  %v1652_v51 = vld [vmem:[%s2063_s3 + $0x70] sm:$0xff] }
  0x16   :  { %319 = vmatpush.bf16.msra.mxu0 %v1622_v24  ;;  %344 = vmatpush.bf16.msra.mxu1 %v1624_v25 }
  0x18   :  { %369 = vmatpush.bf16.msra.mxu2 %v1626_v26  ;;  %394 = vmatpush.bf16.msra.mxu3 %v1628_v27 }
  0x19   :  { %1410 = vmatmul.msk.bf16.vlgmr.msrb.gmra.mxu0 %vm73_vm0, %v1790_v12  ;;  %1419 = vmatmul.msk.bf16.vlgmr.msrb.gmra.mxu1 %vm73_vm0, %v1792_v13 }
  0x1a   :  { %418 = vmatpush.bf16.msrb.mxu0 %v1631_v28  ;;  %443 = vmatpush.bf16.msrb.mxu1 %v1633_v29 }
  0x1b   :  { %1428 = vmatmul.msk.bf16.vlgmr.msrb.gmra.mxu2 %vm73_vm0, %v1790_v12  ;;  %1437 = vmatmul.msk.bf16.vlgmr.msrb.gmra.mxu3 %vm73_vm0, %v1792_v13 }
  0x1c   :  { %468 = vmatpush.bf16.msrb.mxu2 %v1635_v30  ;;  %493 = vmatpush.bf16.msrb.mxu3 %v1637_v31 }
  0x1e   :  { %419 = vmatpush.bf16.msrb.mxu0 %v1630_v32  ;;  %444 = vmatpush.bf16.msrb.mxu1 %v1632_v33 }
  0x20   :  { %469 = vmatpush.bf16.msrb.mxu2 %v1634_v34  ;;  %494 = vmatpush.bf16.msrb.mxu3 %v1636_v35 }
  0x29   :  { %1446 = vmatmul.msk.bf16.vlgmr.msra.gmra.mxu0 %vm73_vm0, %v1790_v12  ;;  %1455 = vmatmul.msk.bf16.vlgmr.msra.gmra.mxu1 %vm73_vm0, %v1792_v13 }
  0x2a   :  { %550 = vmatpush.bf16.msra.mxu0 %v1639_v36  ;;  %575 = vmatpush.bf16.msra.mxu1 %v1641_v37 }
  0x2b   :  { %1464 = vmatmul.msk.bf16.vlgmr.msra.gmra.mxu2 %vm73_vm0, %v1790_v12  ;;  %1473 = vmatmul.msk.bf16.vlgmr.msra.gmra.mxu3 %vm73_vm0, %v1792_v13 }
  0x2c   :  { %600 = vmatpush.bf16.msra.mxu2 %v1643_v38  ;;  %625 = vmatpush.bf16.msra.mxu3 %v1645_v42 }
  0x2e   :  { %551 = vmatpush.bf16.msra.mxu0 %v1638_v40  ;;  %576 = vmatpush.bf16.msra.mxu1 %v1640_v41 }
  0x30   :  { %601 = vmatpush.bf16.msra.mxu2 %v1642_v39  ;;  %626 = vmatpush.bf16.msra.mxu3 %v1644_v43 }
  0x39   :  { %1482 = vmatmul.msk.bf16.vlgmr.msrb.gmra.mxu0 %vm73_vm0, %v1790_v12  ;;  %1491 = vmatmul.msk.bf16.vlgmr.msrb.gmra.mxu1 %vm73_vm0, %v1792_v13 }
  0x3a   :  { %650 = vmatpush.bf16.msrb.mxu0 %v1647_v44  ;;  %675 = vmatpush.bf16.msrb.mxu1 %v1649_v45 }
  0x3b   :  { %1500 = vmatmul.msk.bf16.vlgmr.msrb.gmra.mxu2 %vm73_vm0, %v1790_v12  ;;  %1509 = vmatmul.msk.bf16.vlgmr.msrb.gmra.mxu3 %vm73_vm0, %v1792_v13 }
  0x3c   :  { %700 = vmatpush.bf16.msrb.mxu2 %v1651_v46  ;;  %725 = vmatpush.bf16.msrb.mxu3 %v1653_v50 }
  0x3e   :  { %651 = vmatpush.bf16.msrb.mxu0 %v1646_v48  ;;  %676 = vmatpush.bf16.msrb.mxu1 %v1648_v49 }
  0x40   :  { %701 = vmatpush.bf16.msrb.mxu2 %v1650_v47  ;;  %726 = vmatpush.bf16.msrb.mxu3 %v1652_v51 }
  0x49   :  { %1518 = vmatmul.msk.bf16.vlgmr.msra.gmra.mxu0 %vm73_vm0, %v1790_v12  ;;  %1527 = vmatmul.msk.bf16.vlgmr.msra.gmra.mxu1 %vm73_vm0, %v1792_v13 }
  0x4b   :  { %1536 = vmatmul.msk.bf16.vlgmr.msra.gmra.mxu2 %vm73_vm0, %v1790_v12  ;;  %1545 = vmatmul.msk.bf16.vlgmr.msra.gmra.mxu3 %vm73_vm0, %v1792_v13 }
  0x59   :  { %1554 = vmatmul.msk.bf16.vlgmr.msrb.gmra.mxu0 %vm73_vm0, %v1790_v12  ;;  %1563 = vmatmul.msk.bf16.vlgmr.msrb.gmra.mxu1 %vm73_vm0, %v1792_v13 }
  0x5b   :  { %1572 = vmatmul.msk.bf16.vlgmr.msrb.gmra.mxu2 %vm73_vm0, %v1790_v12  ;;  %1581 = vmatmul.msk.bf16.vlgmr.msrb.gmra.mxu3 %vm73_vm0, %v1792_v13 }
  0x86   :  { %v86_v52 = vpop.f32.mrf.mxu0  ;;  %v114_v53 = vpop.f32.mrf.mxu1 }
  0x87   :  { %v732_v16 = vpack.c.bf16 %v86_v52, %v86_v52  ;;  %v733_v17 = vpack.c.bf16 %v114_v53, %v114_v53 }
  0x8e   :  { %v139_v54 = vpop.f32.mrf.mxu2  ;;  %v164_v55 = vpop.f32.mrf.mxu3 }
  0x8f   :  { %v88_v56 = vpop.f32.mrf.mxu0  ;;  %v116_v57 = vpop.f32.mrf.mxu1  ;;  %v734_v22 = vpack.c.bf16 %v139_v54, %v139_v54  ;;  %v735_v23 = vpack.c.bf16 %v164_v55, %v164_v55 }
  0x96   :  { %v141_v58 = vpop.f32.mrf.mxu2  ;;  %v166_v59 = vpop.f32.mrf.mxu3 }
  0x97   :  { %v189_v60 = vpop.f32.mrf.mxu0  ;;  %v214_v61 = vpop.f32.mrf.mxu1 }
  0x98   :  { %v736_v36 = vpack.c.bf16 %v189_v60, %v189_v60  ;;  %v737_v37 = vpack.c.bf16 %v214_v61, %v214_v61 }
  0x9e   :  { %v239_v62 = vpop.f32.mrf.mxu2  ;;  %v264_v63 = vpop.f32.mrf.mxu3 }
  0x9f   :  { %v191_v0 = vpop.f32.mrf.mxu0  ;;  %v216_v1 = vpop.f32.mrf.mxu1  ;;  %v738_v42 = vpack.c.bf16 %v239_v62, %v239_v62  ;;  %v739_v43 = vpack.c.bf16 %v264_v63, %v264_v63 }
  0xa6   :  { %v241_v2 = vpop.f32.mrf.mxu2  ;;  %v266_v3 = vpop.f32.mrf.mxu3 }
  0xa7   :  { %v321_v4 = vpop.f32.mrf.mxu0  ;;  %v346_v5 = vpop.f32.mrf.mxu1 }
  0xa8   :  { %v740_v6 = vpack.c.bf16 %v321_v4, %v321_v4  ;;  %v741_v7 = vpack.c.bf16 %v346_v5, %v346_v5 }
  0xaa   :  { %v753_v8 = vsel %vm748_vm1, %v740_v6, 0  ;;  %v772_v9 = vsel %vm748_vm1, %v741_v7, 0 }
  0xab   :  { %762 = vmatpush.bf16.xpose.msra.mxu0 %v753_v8  ;;  %781 = vmatpush.bf16.xpose.msra.mxu1 %v772_v9 }
  0xae   :  { %v371_v10 = vpop.f32.mrf.mxu2  ;;  %v396_v11 = vpop.f32.mrf.mxu3 }
  0xaf   :  { %v742_v12 = vpack.c.bf16 %v371_v10, %v371_v10  ;;  %v743_v13 = vpack.c.bf16 %v396_v11, %v396_v11  ;;  %v323_v14 = vpop.f32.mrf.mxu0  ;;  %v348_v15 = vpop.f32.mrf.mxu1 }
  0xb1   :  { %v791_v18 = vsel %vm748_vm1, %v742_v12, 0  ;;  %v810_v19 = vsel %vm748_vm1, %v743_v13, 0 }
  0xb2   :  { %800 = vmatpush.bf16.xpose.msra.mxu2 %v791_v18  ;;  %819 = vmatpush.bf16.xpose.msra.mxu3 %v810_v19 }
  0xb3   :  { %1582 = vmatmul.msk.bf16.vlgmr.msra.gmra.mxu0 %vm748_vm1, %v732_v16  ;;  %1583 = vmatmul.msk.bf16.vlgmr.msra.gmra.mxu1 %vm748_vm1, %v733_v17 }
  0xb6   :  { %v373_v20 = vpop.f32.mrf.mxu2  ;;  %v398_v21 = vpop.f32.mrf.mxu3 }
  0xb7   :  { %v421_v24 = vpop.f32.mrf.mxu0  ;;  %v446_v25 = vpop.f32.mrf.mxu1 }
  0xb8   :  { %v744_v26 = vpack.c.bf16 %v421_v24, %v421_v24  ;;  %v745_v27 = vpack.c.bf16 %v446_v25, %v446_v25 }
  0xb9   :  { %1584 = vmatmul.msk.bf16.vlgmr.msra.gmra.mxu2 %vm748_vm1, %v734_v22  ;;  %1585 = vmatmul.msk.bf16.vlgmr.msra.gmra.mxu3 %vm748_vm1, %v735_v23 }
  0xba   :  { %v829_v28 = vsel %vm748_vm1, %v744_v26, 0  ;;  %v848_v29 = vsel %vm748_vm1, %v745_v27, 0 }
  0xbb   :  { %838 = vmatpush.bf16.xpose.msrb.mxu0 %v829_v28  ;;  %857 = vmatpush.bf16.xpose.msrb.mxu1 %v848_v29 }
  0xbe   :  { %v471_v30 = vpop.f32.mrf.mxu2  ;;  %v496_v31 = vpop.f32.mrf.mxu3 }
  0xbf   :  { %v746_v32 = vpack.c.bf16 %v471_v30, %v471_v30  ;;  %v747_v33 = vpack.c.bf16 %v496_v31, %v496_v31  ;;  %v423_v34 = vpop.f32.mrf.mxu0  ;;  %v448_v35 = vpop.f32.mrf.mxu1 }
  0xc1   :  { %v867_v38 = vsel %vm748_vm1, %v746_v32, 0  ;;  %v886_v39 = vsel %vm748_vm1, %v747_v33, 0 }
  0xc2   :  { %876 = vmatpush.bf16.xpose.msrb.mxu2 %v867_v38  ;;  %895 = vmatpush.bf16.xpose.msrb.mxu3 %v886_v39 }
  0xc3   :  { %1586 = vmatmul.msk.bf16.vlgmr.msrb.gmra.mxu0 %vm748_vm1, %v736_v36  ;;  %1587 = vmatmul.msk.bf16.vlgmr.msrb.gmra.mxu1 %vm748_vm1, %v737_v37 }
  0xc6   :  { %v473_v40 = vpop.f32.mrf.mxu2  ;;  %v498_v41 = vpop.f32.mrf.mxu3 }
  0xc7   :  { %v553_v44 = vpop.f32.mrf.mxu0  ;;  %v578_v45 = vpop.f32.mrf.mxu1 }
  0xc8   :  { %v997_v46 = vpack.c.bf16 %v553_v44, %v553_v44  ;;  %v998_v47 = vpack.c.bf16 %v578_v45, %v578_v45 }
  0xc9   :  { %1588 = vmatmul.msk.bf16.vlgmr.msrb.gmra.mxu2 %vm748_vm1, %v738_v42  ;;  %1589 = vmatmul.msk.bf16.vlgmr.msrb.gmra.mxu3 %vm748_vm1, %v739_v43 }
  0xca   :  { %v1010_v48 = vsel %vm1008_vm2, %v997_v46, 0  ;;  %v1029_v49 = vsel %vm1008_vm2, %v998_v47, 0 }
  0xcb   :  { %1019 = vmatpush.bf16.msra.mxu0 %v1010_v48  ;;  %1038 = vmatpush.bf16.msra.mxu1 %v1029_v49 }
  0xce   :  { %v603_v50 = vpop.f32.mrf.mxu2  ;;  %v628_v55 = vpop.f32.mrf.mxu3 }
  0xcf   :  { %v999_v51 = vpack.c.bf16 %v603_v50, %v603_v50  ;;  %v555_v52 = vpop.f32.mrf.mxu0  ;;  %v580_v53 = vpop.f32.mrf.mxu1  ;;  %v1000_v56 = vpack.c.bf16 %v628_v55, %v628_v55 }
  0xd1   :  { %v1048_v54 = vsel %vm1008_vm2, %v999_v51, 0  ;;  %v1067_v58 = vsel %vm1008_vm2, %v1000_v56, 0 }
  0xd2   :  { %1057 = vmatpush.bf16.msra.mxu2 %v1048_v54  ;;  %1076 = vmatpush.bf16.msra.mxu3 %v1067_v58 }
  0xd6   :  { %v605_v57 = vpop.f32.mrf.mxu2  ;;  %v630_v1 = vpop.f32.mrf.mxu3 }
  0xd7   :  { %v653_v59 = vpop.f32.mrf.mxu0  ;;  %v678_v60 = vpop.f32.mrf.mxu1 }
  0xd8   :  { %v1001_v61 = vpack.c.bf16 %v653_v59, %v653_v59  ;;  %v1002_v62 = vpack.c.bf16 %v678_v60, %v678_v60 }
  0xda   :  { %v1086_v63 = vsel %vm1008_vm2, %v1001_v61, 0  ;;  %v1105_v0 = vsel %vm1008_vm2, %v1002_v62, 0 }
  0xdb   :  { %1095 = vmatpush.bf16.msrb.mxu0 %v1086_v63  ;;  %1114 = vmatpush.bf16.msrb.mxu1 %v1105_v0 }
  0xde   :  { %v703_v2 = vpop.f32.mrf.mxu2  ;;  %v728_v7 = vpop.f32.mrf.mxu3 }
  0xdf   :  { %v1003_v3 = vpack.c.bf16 %v703_v2, %v703_v2  ;;  %v655_v4 = vpop.f32.mrf.mxu0  ;;  %v680_v5 = vpop.f32.mrf.mxu1  ;;  %v1004_v8 = vpack.c.bf16 %v728_v7, %v728_v7 }
  0xe1   :  { %v1124_v6 = vsel %vm1008_vm2, %v1003_v3, 0  ;;  %v1143_v10 = vsel %vm1008_vm2, %v1004_v8, 0 }
  0xe2   :  { %1133 = vmatpush.bf16.msrb.mxu2 %v1124_v6  ;;  %1152 = vmatpush.bf16.msrb.mxu3 %v1143_v10 }
  0xe6   :  { %v705_v9 = vpop.f32.mrf.mxu2  ;;  %v730_v11 = vpop.f32.mrf.mxu3 }
 0x130   :  { %v764_v12 = vpop.f32.mrf.mxu0  ;;  %v783_v13 = vpop.f32.mrf.mxu1 }
 0x131   :  { %v901_v14 = vsel %vm748_vm1, %v764_v12, -inf  ;;  %v904_v17 = vsel %vm748_vm1, %v783_v13, -inf }
 0x132   :  { %902 = vmax.xlane.f32.xlu1 %v901_v14 }
 0x138   :  { %v766_v15 = vpop.f32.mrf.mxu0  ;;  %v785_v16 = vpop.f32.mrf.mxu1 }
 0x13a   :  { %905 = vmax.xlane.f32.xlu1 %v904_v17 }
 0x13c   :  { %v802_v18 = vpop.f32.mrf.mxu2  ;;  %v821_v19 = vpop.f32.mrf.mxu3 }
 0x13d   :  { %v907_v20 = vsel %vm748_vm1, %v802_v18, -inf  ;;  %v910_v26 = vsel %vm748_vm1, %v821_v19, -inf }
 0x13e   :  { %908 = vmax.xlane.f32.xlu0 %v907_v20 }
 0x140   :  { %v840_v21 = vpop.f32.mrf.mxu0  ;;  %v859_v22 = vpop.f32.mrf.mxu1 }
 0x141   :  { %v916_v23 = vsel %vm748_vm1, %v859_v22, -inf  ;;  %v913_v32 = vsel %vm748_vm1, %v840_v21, -inf }
 0x142   :  { %917 = vmax.xlane.f32.xlu1 %v916_v23 }
 0x144   :  { %v804_v24 = vpop.f32.mrf.mxu2  ;;  %v823_v25 = vpop.f32.mrf.mxu3 }
 0x146   :  { %911 = vmax.xlane.f32.xlu0 %v910_v26 }
 0x148   :  { %v842_v27 = vpop.f32.mrf.mxu0  ;;  %v861_v28 = vpop.f32.mrf.mxu1 }
 0x14c   :  { %v878_v29 = vpop.f32.mrf.mxu2  ;;  %v897_v30 = vpop.f32.mrf.mxu3 }
 0x14d   :  { %v919_v31 = vsel %vm748_vm1, %v878_v29, -inf  ;;  %v922_v35 = vsel %vm748_vm1, %v897_v30, -inf }
 0x14e   :  { %920 = vmax.xlane.f32.xlu2 %v919_v31  ;;  %914 = vmax.xlane.f32.xlu0 %v913_v32 }
 0x154   :  { %v880_v33 = vpop.f32.mrf.mxu2  ;;  %v899_v34 = vpop.f32.mrf.mxu3 }
 0x156   :  { %923 = vmax.xlane.f32.xlu2 %v922_v35 }
 0x1a5   :  { %v903_v36 = vpop.xlane.xlu1 %902 }
 0x1a6   :  { %v925_v37 = vsub.f32 %v764_v12, %v903_v36 }
 0x1a8   :  { %v933_v38 = vmul.f32 1.442695, %v925_v37 }
 0x1aa   :  { %1658 = vpow2.f32 %v933_v38 }
 0x1ad   :  { %v906_v40 = vpop.xlane.xlu1 %905 }
 0x1ae   :  { %v926_v44 = vsub.f32 %v783_v13, %v906_v40 }
 0x1b0   :  { %v1659_v39 = vpop.eup %1658  ;;  %v935_v46 = vmul.f32 1.442695, %v926_v44  ;;  %v1166_v44 = vld [vmem:[%s2064_s4] sm:$0xf] }
 0x1b1   :  { %v909_v41 = vpop.xlane.xlu0 %908  ;;  %v949_v42 = vsel %vm748_vm1, %v1659_v39, 0.0 }
 0x1b2   :  { %v927_v43 = vsub.f32 %v802_v18, %v909_v41  ;;  %950 = vadd.xlane.f32.xlu1 %v949_v42 }
 0x1b4   :  { %v937_v45 = vmul.f32 1.442695, %v927_v43 }
 0x1b5   :  { %v918_v52 = vpop.xlane.xlu1 %917 }
 0x1b6   :  { %1660 = vpow2.f32 %v937_v45  ;;  %v930_v59 = vsub.f32 %v859_v22, %v918_v52  ;;  %v1178_v45 = vsel %vm1008_vm2, %v1166_v44, 0  ;;  %v1170_v52 = vld [vmem:[%s2064_s4 + $0x10] sm:$0xf] }
 0x1b7   :  { %1662 = vpow2.f32 %v935_v46  ;;  %v1168_v46 = vld [vmem:[%s2064_s4 + $0x8] sm:$0xf] }
 0x1b8   :  { %v943_v0 = vmul.f32 1.442695, %v930_v59 }
 0x1b9   :  { %v912_v47 = vpop.xlane.xlu0 %911 }
 0x1ba   :  { %v928_v48 = vsub.f32 %v821_v19, %v912_v47  ;;  %v1216_v47 = vsel %vm1008_vm2, %v1168_v46, 0 }
 0x1bc   :  { %v1661_v49 = vpop.eup %1660  ;;  %v939_v50 = vmul.f32 1.442695, %v928_v48  ;;  %v1167_v48 = vld [vmem:[%s2064_s4 + $0x4] sm:$0xf] }
 0x1bd   :  { %v955_v51 = vsel %vm748_vm1, %v1661_v49, 0.0  ;;  %v1663_v55 = vpop.eup %1662 }
 0x1be   :  { %1664 = vpow2.f32 %v939_v50  ;;  %956 = vadd.xlane.f32.xlu2 %v955_v51  ;;  %v952_v62 = vsel %vm748_vm1, %v1663_v55, 0.0  ;;  %v1169_v50 = vld [vmem:[%s2064_s4 + $0xc] sm:$0xf] }
 0x1bf   :  { %v1235_v51 = vsel %vm1008_vm2, %v1169_v50, 0 }
 0x1c1   :  { %v921_v53 = vpop.xlane.xlu2 %920  ;;  %v915_v54 = vpop.xlane.xlu0 %914 }
 0x1c2   :  { %v931_v56 = vsub.f32 %v878_v29, %v921_v53  ;;  %v929_v57 = vsub.f32 %v840_v21, %v915_v54  ;;  %v1254_v53 = vsel %vm1008_vm2, %v1170_v52, 0 }
 0x1c4   :  { %v1665_v58 = vpop.eup %1664  ;;  %v945_v60 = vmul.f32 1.442695, %v931_v56  ;;  %v941_v61 = vmul.f32 1.442695, %v929_v57  ;;  %v1172_v56 = vld [vmem:[%s2064_s4 + $0x18] sm:$0xf] }
 0x1c5   :  { %v958_v63 = vsel %vm748_vm1, %v1665_v58, 0.0  ;;  %v1292_v57 = vsel %vm1008_vm2, %v1172_v56, 0 }
 0x1c6   :  { %1666 = vpow2.f32 %v945_v60  ;;  %953 = vadd.xlane.f32.xlu2 %v952_v62  ;;  %959 = vadd.xlane.f32.xlu0 %v958_v63  ;;  %v1173_v60 = vld [vmem:[%s2064_s4 + $0x1c] sm:$0xf] }
 0x1c7   :  { %1668 = vpow2.f32 %v941_v61  ;;  %v1311_v61 = vsel %vm1008_vm2, %v1173_v60, 0 }
 0x1c8   :  { %1670 = vpow2.f32 %v943_v0 }
 0x1c9   :  { %v924_v1 = vpop.xlane.xlu2 %923 }
 0x1ca   :  { %v932_v2 = vsub.f32 %v897_v30, %v924_v1 }
 0x1cc   :  { %v1667_v3 = vpop.eup %1666  ;;  %v947_v4 = vmul.f32 1.442695, %v932_v2 }
 0x1cd   :  { %v1669_v5 = vpop.eup %1668  ;;  %v967_v6 = vsel %vm748_vm1, %v1667_v3, 0.0 }
 0x1ce   :  { %1672 = vpow2.f32 %v947_v4  ;;  %968 = vadd.xlane.f32.xlu0 %v967_v6  ;;  %v961_v7 = vsel %vm748_vm1, %v1669_v5, 0.0  ;;  %v1671_v8 = vpop.eup %1670 }
 0x1cf   :  { %962 = vadd.xlane.f32.xlu2 %v961_v7  ;;  %v964_v11 = vsel %vm748_vm1, %v1671_v8, 0.0 }
 0x1d4   :  { %v1673_v9 = vpop.eup %1672 }
 0x1d5   :  { %v970_v10 = vsel %vm748_vm1, %v1673_v9, 0.0 }
 0x1d6   :  { %971 = vadd.xlane.f32.xlu1 %v970_v10  ;;  %965 = vadd.xlane.f32.xlu0 %v964_v11 }
 0x225   :  { %v951_v12 = vpop.xlane.xlu1 %950 }
 0x226   :  { %1674 = vrcp.f32 %v951_v12 }
 0x22c   :  { %v1675_v13 = vpop.eup %1674 }
 0x22d   :  { %v981_v14 = vmul.f32 %v1675_v13, %v1659_v39 }
 0x22f   :  { %v989_v15 = vpack.c.bf16 %v981_v14, %v981_v14 }
 0x231   :  { %v957_v16 = vpop.xlane.xlu2 %956  ;;  %1590 = vmatmul.msk.bf16.vlgmr.msra.gmra.mxu0 %vm748_vm1, %v989_v15 }
 0x232   :  { %1676 = vrcp.f32 %v957_v16  ;;  %1187 = vmatpush.bf16.msra.mxu0 %v1178_v45 }
 0x238   :  { %v1677_v17 = vpop.eup %1676 }
 0x239   :  { %v983_v18 = vmul.f32 %v1677_v17, %v1661_v49  ;;  %v954_v19 = vpop.xlane.xlu2 %953  ;;  %v960_v20 = vpop.xlane.xlu0 %959  ;;  %v1197_v49 = vsel %vm1008_vm2, %v1167_v48, 0 }
 0x23a   :  { %1678 = vrcp.f32 %v954_v19 }
 0x23b   :  { %v991_v21 = vpack.c.bf16 %v983_v18, %v983_v18  ;;  %1680 = vrcp.f32 %v960_v20 }
 0x23d   :  { %1592 = vmatmul.msk.bf16.vlgmr.msra.gmra.mxu2 %vm748_vm1, %v991_v21 }
 0x23e   :  { %1225 = vmatpush.bf16.msra.mxu2 %v1216_v47 }
 0x240   :  { %v1679_v22 = vpop.eup %1678 }
 0x241   :  { %v1681_v23 = vpop.eup %1680  ;;  %v982_v24 = vmul.f32 %v1679_v22, %v1663_v55  ;;  %v969_v25 = vpop.xlane.xlu0 %968 }
 0x242   :  { %v984_v26 = vmul.f32 %v1681_v23, %v1665_v58  ;;  %v963_v27 = vpop.xlane.xlu2 %962  ;;  %1682 = vrcp.f32 %v969_v25  ;;  %v1171_v58 = vld [vmem:[%s2064_s4 + $0x14] sm:$0xf] }
 0x243   :  { %v990_v28 = vpack.c.bf16 %v982_v24, %v982_v24  ;;  %1684 = vrcp.f32 %v963_v27  ;;  %v1273_v59 = vsel %vm1008_vm2, %v1171_v58, 0 }
 0x244   :  { %v992_v29 = vpack.c.bf16 %v984_v26, %v984_v26 }
 0x245   :  { %1591 = vmatmul.msk.bf16.vlgmr.msra.gmra.mxu1 %vm748_vm1, %v990_v28 }
 0x246   :  { %1593 = vmatmul.msk.bf16.vlgmr.msra.gmra.mxu3 %vm748_vm1, %v992_v29  ;;  %1206 = vmatpush.bf16.msra.mxu1 %v1197_v49 }
 0x247   :  { %1244 = vmatpush.bf16.msra.mxu3 %v1235_v51 }
 0x248   :  { %v1683_v30 = vpop.eup %1682 }
 0x249   :  { %v1685_v31 = vpop.eup %1684  ;;  %v987_v32 = vmul.f32 %v1683_v30, %v1667_v3  ;;  %v972_v33 = vpop.xlane.xlu1 %971 }
 0x24a   :  { %v966_v34 = vpop.xlane.xlu0 %965  ;;  %v985_v35 = vmul.f32 %v1685_v31, %v1669_v5  ;;  %1686 = vrcp.f32 %v972_v33 }
 0x24b   :  { %v995_v36 = vpack.c.bf16 %v987_v32, %v987_v32  ;;  %1688 = vrcp.f32 %v966_v34 }
 0x24c   :  { %v993_v37 = vpack.c.bf16 %v985_v35, %v985_v35 }
 0x24d   :  { %1596 = vmatmul.msk.bf16.vlgmr.msrb.gmra.mxu2 %vm748_vm1, %v995_v36  ;;  %v1657_v36 = vld [vmem:[%s2065_s5] ss:$0 sm:$0xff]  ;;  %s1352_s5 = sshll.u32 %s1716_s8, 4  ;;  %s1353_s5 = int_to_ptr.vmem [resolvable:$true] %s1352_s5 }
 0x24e   :  { %1594 = vmatmul.msk.bf16.vlgmr.msrb.gmra.mxu0 %vm748_vm1, %v993_v37  ;;  %1301 = vmatpush.bf16.msrb.mxu2 %v1292_v57 }
 0x24f   :  { %1263 = vmatpush.bf16.msrb.mxu0 %v1254_v53 }
 0x250   :  { %v1687_v38 = vpop.eup %1686 }
 0x251   :  { %v1689_v39 = vpop.eup %1688  ;;  %v988_v40 = vmul.f32 %v1687_v38, %v1673_v9 }
 0x252   :  { %v986_v41 = vmul.f32 %v1689_v39, %v1671_v8 }
 0x253   :  { %v996_v42 = vpack.c.bf16 %v988_v40, %v988_v40 }
 0x254   :  { %v994_v43 = vpack.c.bf16 %v986_v41, %v986_v41 }
 0x256   :  { %1595 = vmatmul.msk.bf16.vlgmr.msrb.gmra.mxu1 %vm748_vm1, %v994_v43  ;;  %1597 = vmatmul.msk.bf16.vlgmr.msrb.gmra.mxu3 %vm748_vm1, %v996_v42 }
 0x257   :  { %1282 = vmatpush.bf16.msrb.mxu1 %v1273_v59  ;;  %1320 = vmatpush.bf16.msrb.mxu3 %v1311_v61 }
 0x2ae   :  { %v1021_v54 = vpop.f32.mrf.mxu0 }
 0x2af   :  { %v1158_v55 = vpack.c.bf16 %v1021_v54, %v1021_v54 }
 0x2b1   :  { %1598 = vmatmul.msk.bf16.vlgmr.msra.gmra.mxu0 %vm748_vm1, %v1158_v55 }
 0x2b6   :  { %v1023_v62 = vpop.f32.mrf.mxu0 }
 0x2c0   :  { %v1059_v63 = vpop.f32.mrf.mxu2 }
 0x2c1   :  { %v1160_v0 = vpack.c.bf16 %v1059_v63, %v1059_v63 }
 0x2c2   :  { %v1040_v1 = vpop.f32.mrf.mxu1 }
 0x2c3   :  { %v1159_v2 = vpack.c.bf16 %v1040_v1, %v1040_v1  ;;  %1600 = vmatmul.msk.bf16.vlgmr.msra.gmra.mxu2 %vm748_vm1, %v1160_v0 }
 0x2c5   :  { %1599 = vmatmul.msk.bf16.vlgmr.msra.gmra.mxu1 %vm748_vm1, %v1159_v2 }
 0x2c8   :  { %v1061_v3 = vpop.f32.mrf.mxu2 }
 0x2c9   :  { %v1078_v4 = vpop.f32.mrf.mxu3 }
 0x2ca   :  { %v1161_v5 = vpack.c.bf16 %v1078_v4, %v1078_v4  ;;  %v1042_v6 = vpop.f32.mrf.mxu1 }
 0x2cb   :  { %v1097_v7 = vpop.f32.mrf.mxu0 }
 0x2cc   :  { %v1162_v8 = vpack.c.bf16 %v1097_v7, %v1097_v7  ;;  %1601 = vmatmul.msk.bf16.vlgmr.msra.gmra.mxu3 %vm748_vm1, %v1161_v5 }
 0x2ce   :  { %1602 = vmatmul.msk.bf16.vlgmr.msrb.gmra.mxu0 %vm748_vm1, %v1162_v8 }
 0x2d0   :  { %v1135_v9 = vpop.f32.mrf.mxu2 }
 0x2d1   :  { %v1080_v10 = vpop.f32.mrf.mxu3  ;;  %v1164_v11 = vpack.c.bf16 %v1135_v9, %v1135_v9 }
 0x2d3   :  { %v1099_v12 = vpop.f32.mrf.mxu0  ;;  %v1116_v13 = vpop.f32.mrf.mxu1  ;;  %1604 = vmatmul.msk.bf16.vlgmr.msrb.gmra.mxu2 %vm748_vm1, %v1164_v11 }
 0x2d4   :  { %v1163_v14 = vpack.c.bf16 %v1116_v13, %v1116_v13 }
 0x2d6   :  { %1603 = vmatmul.msk.bf16.vlgmr.msrb.gmra.mxu1 %vm748_vm1, %v1163_v14 }
 0x2d8   :  { %v1137_v15 = vpop.f32.mrf.mxu2 }
 0x2d9   :  { %v1154_v16 = vpop.f32.mrf.mxu3 }
 0x2da   :  { %v1165_v17 = vpack.c.bf16 %v1154_v16, %v1154_v16 }
 0x2db   :  { %v1118_v18 = vpop.f32.mrf.mxu1 }
 0x2dc   :  { %1605 = vmatmul.msk.bf16.vlgmr.msrb.gmra.mxu3 %vm748_vm1, %v1165_v17 }
 0x2e1   :  { %v1156_v19 = vpop.f32.mrf.mxu3 }
 0x32e   :  { %v1189_v20 = vpop.f32.mrf.mxu0 }
 0x32f   :  { %v1326_v29 = vsel %vm73_vm0, %v1189_v20, 0.0 }
 0x336   :  { %v1191_v21 = vpop.f32.mrf.mxu0 }
 0x342   :  { %v1208_v22 = vpop.f32.mrf.mxu1 }
 0x343   :  { %v1333_v43 = vsel %vm73_vm0, %v1208_v22, 0.0 }
 0x346   :  { %v1227_v23 = vpop.f32.mrf.mxu2 }
 0x347   :  { %v1327_v28 = vsel %vm73_vm0, %v1227_v23, 0.0 }
 0x348   :  { %v1328_v33 = vadd.f32 %v1327_v28, %v1326_v29 }
 0x34a   :  { %v1210_v24 = vpop.f32.mrf.mxu1 }
 0x34b   :  { %v1265_v25 = vpop.f32.mrf.mxu0 }
 0x34c   :  { %v1329_v30 = vsel %vm73_vm0, %v1265_v25, 0.0 }
 0x34d   :  { %v1330_v34 = vadd.f32 %v1329_v30, %v1328_v33 }
 0x34e   :  { %v1229_v26 = vpop.f32.mrf.mxu2 }
 0x34f   :  { %v1246_v27 = vpop.f32.mrf.mxu3 }
 0x350   :  { %v1334_v40 = vsel %vm73_vm0, %v1246_v27, 0.0 }
 0x351   :  { %v1335_v45 = vadd.f32 %v1334_v40, %v1333_v43 }
 0x353   :  { %v1267_v31 = vpop.f32.mrf.mxu0  ;;  %v1284_v32 = vpop.f32.mrf.mxu1 }
 0x354   :  { %v1336_v44 = vsel %vm73_vm0, %v1284_v32, 0.0 }
 0x355   :  { %v1337_v47 = vadd.f32 %v1336_v44, %v1335_v45 }
 0x356   :  { %v1303_v35 = vpop.f32.mrf.mxu2 }
 0x357   :  { %v1248_v37 = vpop.f32.mrf.mxu3  ;;  %v1331_v38 = vsel %vm73_vm0, %v1303_v35, 0.0 }
 0x358   :  { %v1332_v39 = vadd.f32 %v1331_v38, %v1330_v34 }
 0x35a   :  { %v1344_v41 = vadd.f32 %v1657_v36, %v1332_v39 }
 0x35b   :  { %v1286_v42 = vpop.f32.mrf.mxu1 }
 0x35c   :  { %1346 = vst.msk [vmem:[#allocation2] sm:$0xff] %vm73_vm0, %v1344_v41 }
 0x35e   :  { %v1305_v46 = vpop.f32.mrf.mxu2 }
 0x35f   :  { %v1322_v48 = vpop.f32.mrf.mxu3 }
 0x360   :  { %v1338_v49 = vsel %vm73_vm0, %v1322_v48, 0.0 }
 0x361   :  { %v1339_v50 = vadd.f32 %v1338_v49, %v1337_v47 }
 0x363   :  { %v1345_v51 = vadd.f32 %v1657_v36, %v1339_v50 }
 0x365   :  { %1347 = vst.msk [vmem:[#allocation2 + $0x8] sm:$0xff] %vm73_vm0, %v1345_v51 }
 0x366   :  { %1360 = dma.vmem_to_hbm [thread:$0]  %s1353_s5, 256, %s1355_s11, [#allocation3], %s1717_s12, %s1717_s12, %s1718_s13  }
 0x367   :  { %v1324_v52 = vpop.f32.mrf.mxu3 }
 0x368   :  { %1714 = dma.done.wait [#allocation3], 256  }
 0x369   :  { %1715 = vsyncadd [#allocation3], 4294967040 }
 0x36a   :  { %1365 = vsyncpa [#allocation3], 1 }

</bundles_post_ra>
